<compile_context>
chip_gen: v7x
topology: tpu7x:2x2x1
jax: 0.10.0
libtpu: 0.0.40
codegen_flags: <defaults>
</compile_context>

<pallas_src>
import math

import jax
import jax.numpy as jnp
import numpy as np
from jax.experimental import pallas as pl
from jax.experimental.pallas import tpu as pltpu


_X_BUFFER_BYTES = 16 * 1024 * 1024     # target size of ONE pipeline buffer of x
_VMEM_LIMIT_BYTES = 48 * 1024 * 1024   # 2 x-buffers + out/weight, < v7x 64 MiB


def _round_up(n, m):
    return ((n + m - 1) // m) * m


def _linear_kernel(x_ref, w_ref, b_ref, o_ref):
    # x_ref: (tile_rows, fp)        native-dtype x tile (streamed from HBM)
    # w_ref: (pack, fp)             block-diagonal weight, VMEM-resident
    # b_ref: (1, 1) f32             bias scalar in SMEM
    # o_ref: (1, pack, tile_rows)   lane-dense output tile
    acc = jax.lax.dot_general(
        w_ref[...], x_ref[...],
        dimension_numbers=(((1,), (1,)), ((), ())),   # contract feature dims
        preferred_element_type=jnp.float32,
    )                                                 # (pack, tile_rows) on MXU
    o_ref[...] = (acc + b_ref[0, 0]).astype(o_ref.dtype)[None]


def _choose_tile_rows(rows_total, bytes_per_row):
    """Rows per grid step, sized against one pipeline buffer of x."""
    max_rows = max(8, ((_X_BUFFER_BYTES // bytes_per_row) // 8) * 8)
    if rows_total <= max_rows:
        if rows_total <= 1024:
            return rows_total            # small problem: one full-extent tile
        # Enough work to matter: keep >= 2 grid steps so both v7x TensorCores
        # ("parallel" batch axis) get a block; keep tiles 128-lane aligned.
        return min(max_rows, _round_up(pl.cdiv(rows_total, 2), 128))
    # Streaming regime: the biggest 128-aligned tile that fits the budget
    # (amortizes the ~0.35 us/grid-step overhead, long contiguous DMAs).
    return (max_rows // 128) * 128 if max_rows >= 128 else max_rows


def binary_classifier_forward(x, weight, bias):
    """Forward pass of BinaryClassifier: out = x @ weight.T + bias.

    Args:
      x:      (batch, 2*input_dim), any float dtype (streamed as-is)
      weight: (1, 2*input_dim)  (torch.nn.Linear.weight layout)
      bias:   (1,)

    Returns:
      (batch, 1) in x.dtype
    """
    batch, feat = x.shape
    dt = x.dtype

    # ---- lane packing for narrow feature widths ------------------------------
    pack = 1
    if feat < 128 and 128 % feat == 0 and batch % (128 // feat) == 0:
        pack = 128 // feat
    fp = pack * feat
    rows_total = batch // pack
    x_folded = x.reshape(rows_total, fp)         # contiguous fold: no HBM copy

    # Block-diagonal weight: row p holds w in columns [p*feat, (p+1)*feat).
    w = weight.reshape(1, feat)
    w_bd = jnp.kron(jnp.eye(pack, dtype=w.dtype), w).astype(dt)    # (pack, fp)
    b = bias.reshape(1, 1).astype(jnp.float32)

    # ---- tile sizing with lane-padded VMEM accounting ------------------------
    bytes_per_row = _round_up(fp, 128) * jnp.dtype(dt).itemsize
    tile_rows = _choose_tile_rows(rows_total, bytes_per_row)
    num_tiles = pl.cdiv(rows_total, tile_rows)   # ragged tail handled by Pallas
    vmem_limit = max(_VMEM_LIMIT_BYTES,
                     2 * tile_rows * bytes_per_row + (8 << 20))

    out = pl.pallas_call(
        _linear_kernel,
        out_shape=jax.ShapeDtypeStruct((num_tiles, pack, tile_rows), dt),
        grid=(num_tiles,),
        in_specs=[
            pl.BlockSpec((tile_rows, fp), lambda i: (i, 0)),      # stream x
            pl.BlockSpec((pack, fp), lambda i: (0, 0)),           # resident w
            pl.BlockSpec(memory_space=pltpu.MemorySpace.SMEM),    # bias scalar
        ],
        out_specs=pl.BlockSpec((1, pack, tile_rows), lambda i: (i, 0, 0)),
        compiler_params=pltpu.CompilerParams(
            dimension_semantics=("parallel",),
            vmem_limit_bytes=vmem_limit,
        ),
        cost_estimate=pl.CostEstimate(
            flops=2 * batch * feat,
            transcendentals=0,
            bytes_accessed=int(x.size) * jnp.dtype(dt).itemsize
            + int(w_bd.size) * jnp.dtype(dt).itemsize
            + num_tiles * pack * tile_rows * jnp.dtype(dt).itemsize,
        ),
    )(x_folded, w_bd, b)

    # out[t, p, r] is the score of sample (t*tile_rows + r)*pack + p.
    out = jnp.transpose(out, (0, 2, 1)).reshape(-1)[:batch]
    return out.reshape(batch, 1)


def init_params(input_dim, key):
    """Deterministic init mimicking torch.nn.Linear's default uniform init."""
    in_features = 2 * input_dim
    bound = 1.0 / math.sqrt(in_features)
    k_w, k_b = jax.random.split(key)
    weight = jax.random.uniform(
        k_w, (1, in_features), minval=-bound, maxval=bound, dtype=jnp.float32)
    bias = jax.random.uniform(
        k_b, (1,), minval=-bound, maxval=bound, dtype=jnp.float32)
    return weight, bias


def _snap_bf16(a):
    # Snap values onto the bf16 grid (still stored as f32) so the correctness
    # check is independent of how the MXU decomposes an f32 matmul.
    return a.astype(jnp.bfloat16).astype(jnp.float32)


def _check(x, weight, bias, atol=1e-4):
    out = jax.block_until_ready(binary_classifier_forward(x, weight, bias))
    ref = (np.asarray(x, np.float64) @ np.asarray(weight, np.float64).T
           + np.asarray(bias, np.float64))
    assert out.shape == (x.shape[0], 1), out.shape
    err = np.max(np.abs(np.asarray(out, np.float64) - ref))
    assert err < atol, f"mismatch vs reference: max abs err {err}"


if __name__ == "__main__":
    key = jax.random.PRNGKey(0)
    k_p1, k_p2, k_x1, k_x2, k_x3 = jax.random.split(key, 5)

    # Case 1: input_dim=16 -> feat=32 divides 128 -> packed path
    # (4 samples folded per 128-lane row), single tile.
    input_dim = 16
    weight, bias = init_params(input_dim, k_p1)
    weight, bias = _snap_bf16(weight), _snap_bf16(bias)
    x1 = _snap_bf16(jax.random.normal(k_x1, (8, 2 * input_dim), jnp.float32))
    _check(x1, weight, bias)

    # Case 2: batch=20 (not a multiple of 8) on the same params -> packed path
    # with a non-8-aligned, full-extent row block.
    x2 = _snap_bf16(jax.random.normal(k_x2, (20, 2 * input_dim), jnp.float32))
    _check(x2, weight, bias)

    # Case 3: input_dim=24 -> feat=48 does not divide 128, odd batch ->
    # unpacked fallback path.
    input_dim3 = 24
    weight3, bias3 = init_params(input_dim3, k_p2)
    weight3, bias3 = _snap_bf16(weight3), _snap_bf16(bias3)
    x3 = _snap_bf16(jax.random.normal(k_x3, (13, 2 * input_dim3), jnp.float32))
    _check(x3, weight3, bias3)

    print("KERNEL_OK")
</pallas_src>

<mosaic_0001>
module attributes {stable_mosaic.version = 11 : i64} {
  func.func @_linear_kernel(%arg0: i32, %arg1: memref<2x128xf32, #tpu.memory_space<vmem>>, %arg2: memref<4x128xf32, #tpu.memory_space<vmem>>, %arg3: memref<1x1xf32, #tpu.memory_space<smem>>, %arg4: memref<1x4x2xf32, #tpu.memory_space<vmem>>) attributes {dimension_semantics = [#tpu.dimension_semantics<parallel>], iteration_bounds = array<i64: 1>, scalar_prefetch = 0 : i64, scratch_operands = 0 : i64, tpu.core_type = #tpu.core_type<tc>, window_params = [{transform_indices = @transform_0, window_bounds = array<i64: 2, 128>}, {pipeline_mode = #tpu.pipeline_mode<synchronous>, transform_indices = @transform_1, window_bounds = array<i64: 4, 128>}, {transform_indices = @transform_2, window_bounds = array<i64: 1, 1>}, {transform_indices = @transform_3, window_bounds = array<i64: 1, 4, 2>}]} {
    %c0 = arith.constant 0 : index
    %c0_0 = arith.constant 0 : index
    %0 = vector.load %arg2[%c0, %c0_0] : memref<4x128xf32, #tpu.memory_space<vmem>>, vector<4x128xf32>
    %c0_1 = arith.constant 0 : index
    %c0_2 = arith.constant 0 : index
    %1 = vector.load %arg1[%c0_1, %c0_2] : memref<2x128xf32, #tpu.memory_space<vmem>>, vector<2x128xf32>
    %cst = arith.constant dense<0.000000e+00> : vector<4x2xf32>
    %2 = tpu.matmul %0, %1, %cst {dimension_numbers = #tpu.dot_dimension_numbers<[1], [1], [0], [0], [0, 0, 1, 0], [], []>} : vector<4x128xf32>, vector<2x128xf32>, vector<4x2xf32> -> vector<4x2xf32>
    %c0_3 = arith.constant 0 : index
    %c0_4 = arith.constant 0 : index
    %3 = memref.load %arg3[%c0_3, %c0_4] : memref<1x1xf32, #tpu.memory_space<smem>>
    %4 = vector.broadcast %3 : f32 to vector<4x2xf32>
    %5 = arith.addf %2, %4 : vector<4x2xf32>
    %6 = vector.shape_cast %5 : vector<4x2xf32> to vector<1x4x2xf32>
    %c0_5 = arith.constant 0 : index
    %c0_6 = arith.constant 0 : index
    %c0_7 = arith.constant 0 : index
    %7 = vector.load %arg4[%c0_5, %c0_6, %c0_7] : memref<1x4x2xf32, #tpu.memory_space<vmem>>, vector<1x4x2xf32>
    tpu.vector_store %arg4[%c0_5, %c0_6, %c0_7], %6 {strides = array<i32>} : memref<1x4x2xf32, #tpu.memory_space<vmem>>, vector<1x4x2xf32>,
    return
  }
  func.func @transform_0(%arg0: i32) -> (i32, i32) {
    %c0_i32 = arith.constant 0 : i32
    %c0_i32_0 = arith.constant 0 : i32
    return %arg0, %c0_i32 : i32, i32
  }
  func.func @transform_1(%arg0: i32) -> (i32, i32) {
    %c0_i32 = arith.constant 0 : i32
    %c0_i32_0 = arith.constant 0 : i32
    %c0_i32_1 = arith.constant 0 : i32
    return %c0_i32, %c0_i32_0 : i32, i32
  }
  func.func @transform_2(%arg0: i32) -> (i32, i32) {
    %c0_i32 = arith.constant 0 : i32
    %c0_i32_0 = arith.constant 0 : i32
    %c0_i32_1 = arith.constant 0 : i32
    return %c0_i32, %c0_i32_0 : i32, i32
  }
  func.func @transform_3(%arg0: i32) -> (i32, i32, i32) {
    %c0_i32 = arith.constant 0 : i32
    %c0_i32_0 = arith.constant 0 : i32
    %c0_i32_1 = arith.constant 0 : i32
    return %arg0, %c0_i32, %c0_i32_0 : i32, i32, i32
  }
}

</mosaic_0001>

<bundles_post_ra>
// kernel: tpu_custom_call.1
= control target key start
LH: loop header
LB: loop body
LE: loop exit
PB: predicated region body
PF: predicated region fallthrough
CT: control target
= control target key end

     0   :  { %v104_v0 = vmov 0.0   ;;  %vm105_vm0 = vmmov 0   ;;  %vm89_vm1 = vcmask 11264   ;;  %s138_s0 = inlined_call_operand.vmem [shape: f32[2,128], index: 0, kind: input, shape index: {}]   ;;  %s139_s1 = inlined_call_operand.vmem [shape: f32[4,128], index: 1, kind: input, shape index: {}]   ;;  %s140_s2 = inlined_call_operand.<no memory space> [shape: f32[1,1], index: 2, kind: input, shape index: {}]   ;;  %s141_s3 = inlined_call_operand.vmem [shape: f32[1,4,2], index: 3, kind: output, shape index: {}]  }
   0x1   :  { %97 = vmatprep.subr.mxu0 %v104_v0  ;;  %v16_v1 = vld [vmem:[%s138_s0] sm:$0x3]  ;;  %99 = vmatprep.mubr.msk.f32.mxu0 %vm105_vm0, %v104_v0  ;;  %v18_v3 = vstv %s140_s2 }
   0x2   :  { %98 = vmatpush3.xpose.msra.mxu0 %v16_v1  ;;  %v15_v2 = vld [vmem:[%s139_s1] sm:$0xf] }
   0x5   :  { %100 = vmatmul.mubr.f32.vlgmr.msra.gmra.mrb[0].mxu0 %v15_v2 }
  0xd8   :  { %v85_v4 = vpop.f32.mrb[0].mxu0 }
  0xd9   :  { %v86_v5 = vadd.f32 %v85_v4, %v18_v3  ;;  %v101_v6 = vpop.f32.mrb[1].mxu0 }
  0xdb   :  { %90 = vst.msk [vmem:[%s141_s3] sm:$0xf] %vm89_vm1, %v86_v5 }

</bundles_post_ra>
